<compile_context>
chip_gen: v6e
topology: v6e:2x2x1
jax: 0.10.0
libtpu: 0.0.40
codegen_flags: <defaults>
</compile_context>

<pallas_src>
import functools

import jax
import jax.numpy as jnp
from jax.experimental import pallas as pl
from jax.experimental.pallas import tpu as pltpu


# ---------------------------------------------------------------------------
# Shared per-step GRU math (runs inside the kernels).
# ---------------------------------------------------------------------------
def _gru_step(h, x, w_hzr, w_x3, b3, whh, wo, bo, H):
    """h, x, biases: f32. Matmul weights may be bf16; accumulation is f32."""
    wdt = w_hzr.dtype
    # fused gate matmuls: (B,H)@(H,2H) and (B,I)@(I,3H)
    hzr = jnp.dot(h.astype(wdt), w_hzr, preferred_element_type=jnp.float32)
    x3 = jnp.dot(x.astype(wdt), w_x3, preferred_element_type=jnp.float32) + b3

    zt = jax.nn.sigmoid(hzr[:, :H] + x3[:, :H])
    rt = jax.nn.sigmoid(hzr[:, H:2 * H] + x3[:, H:2 * H])

    ht_pre = (jnp.dot((rt * h).astype(wdt), whh, preferred_element_type=jnp.float32)
              + x3[:, 2 * H:])
    ht_tilda = jnp.tanh(ht_pre)

    # (1 - zt) * h + zt * ht_tilda, one fewer VALU op:
    new_h = h + zt * (ht_tilda - h)

    out = jax.nn.sigmoid(
        jnp.dot(new_h.astype(wdt), wo, preferred_element_type=jnp.float32) + bo)
    return out, new_h


# ---------------------------------------------------------------------------
# Single-step kernel (matches the PyTorch forward exactly: one cell step).
# ---------------------------------------------------------------------------
def gru_cell_kernel(h_ref, x_ref, w_hzr_ref, w_x3_ref, b3_ref, whh_ref, wo_ref,
                    bo_ref, out_ref, newh_ref, *, H):
    out, new_h = _gru_step(h_ref[...], x_ref[...],
                           w_hzr_ref[...], w_x3_ref[...], b3_ref[...],
                           whh_ref[...], wo_ref[...], bo_ref[...], H)
    out_ref[...] = out.astype(out_ref.dtype)
    newh_ref[...] = new_h.astype(newh_ref.dtype)


def ex_gru_forward(x, hidden_state, fused):
    """One GRU-cell step (the nn.Module forward). Everything in one kernel."""
    B, _ = x.shape
    _, H = hidden_state.shape
    O = fused["wo"].shape[1]

    vmem = pl.BlockSpec(memory_space=pltpu.MemorySpace.VMEM)
    args = (hidden_state, x, fused["w_hzr"], fused["w_x3"], fused["b3"],
            fused["whh"], fused["wo"], fused["bo"])
    out, new_h = pl.pallas_call(
        functools.partial(gru_cell_kernel, H=H),
        out_shape=(jax.ShapeDtypeStruct((B, O), jnp.float32),
                   jax.ShapeDtypeStruct((B, H), jnp.float32)),
        in_specs=[vmem] * len(args),
        out_specs=(vmem, vmem),
    )(*args)
    return out, new_h


# ---------------------------------------------------------------------------
# Whole-sequence kernel: time loop inside one pallas_call.
# Weights stay resident in VMEM; hidden carried in a VMEM scratch accumulator.
# ---------------------------------------------------------------------------
def gru_seq_kernel(h0_ref, x_ref, w_hzr_ref, w_x3_ref, b3_ref, whh_ref, wo_ref,
                   bo_ref, out_ref, hfin_ref, h_scr, *, H):
    t = pl.program_id(0)

    @pl.when(t == 0)
    def _():
        h_scr[...] = h0_ref[...]

    out, new_h = _gru_step(h_scr[...], x_ref[...],
                           w_hzr_ref[...], w_x3_ref[...], b3_ref[...],
                           whh_ref[...], wo_ref[...], bo_ref[...], H)
    h_scr[...] = new_h
    out_ref[...] = out.astype(out_ref.dtype)

    @pl.when(t == pl.num_programs(0) - 1)
    def _():
        hfin_ref[...] = new_h.astype(hfin_ref.dtype)


def ex_gru_sequence(x_seq, hidden0, fused):
    """Runs the GRU cell over a (T, B, I) sequence inside a single pallas_call."""
    T, B, I = x_seq.shape
    _, H = hidden0.shape
    O = fused["wo"].shape[1]

    const2 = lambda t: (0, 0)  # weights / biases / h0 stay resident across the grid

    in_specs = [
        pl.BlockSpec((B, H), const2),                      # h0
        pl.BlockSpec((None, B, I), lambda t: (t, 0, 0)),   # x_t streamed per step
        pl.BlockSpec(fused["w_hzr"].shape, const2),
        pl.BlockSpec(fused["w_x3"].shape, const2),
        pl.BlockSpec(fused["b3"].shape, const2),
        pl.BlockSpec(fused["whh"].shape, const2),
        pl.BlockSpec(fused["wo"].shape, const2),
        pl.BlockSpec(fused["bo"].shape, const2),
    ]
    out_specs = (
        pl.BlockSpec((None, B, O), lambda t: (t, 0, 0)),   # per-step outputs
        pl.BlockSpec((B, H), const2),                      # final hidden (written on last step)
    )

    outs, h_fin = pl.pallas_call(
        functools.partial(gru_seq_kernel, H=H),
        grid=(T,),
        out_shape=(jax.ShapeDtypeStruct((T, B, O), jnp.float32),
                   jax.ShapeDtypeStruct((B, H), jnp.float32)),
        in_specs=in_specs,
        out_specs=out_specs,
        scratch_shapes=[pltpu.VMEM((B, H), jnp.float32)],  # carried hidden state
        compiler_params=pltpu.CompilerParams(
            dimension_semantics=("arbitrary",)),           # time axis is sequential
    )(hidden0, x_seq, fused["w_hzr"], fused["w_x3"], fused["b3"],
      fused["whh"], fused["wo"], fused["bo"])
    return outs, h_fin


# ---------------------------------------------------------------------------
# Parameters
# ---------------------------------------------------------------------------
def init_params(key, input_size, hidden_size, output_size):
    """nn.Linear-style init (uniform +/- 1/sqrt(fan_in)); split hidden/x parts,
    stored transposed to (in, out)."""
    def linear(k, fan_in, fan_out):
        kw, kb = jax.random.split(k)
        bound = 1.0 / jnp.sqrt(fan_in)
        w = jax.random.uniform(kw, (fan_in, fan_out), jnp.float32, -bound, bound)
        b = jax.random.uniform(kb, (1, fan_out), jnp.float32, -bound, bound)
        return w, b

    k1, k2, k3, k4 = jax.random.split(key, 4)
    cat_in = input_size + hidden_size
    H = hidden_size

    wz, bz = linear(k1, cat_in, hidden_size)
    wr, br = linear(k2, cat_in, hidden_size)
    wh, bh = linear(k3, cat_in, hidden_size)
    wo, bo = linear(k4, hidden_size, output_size)

    # cat order in the PyTorch model is (hidden_state, x): first H rows act on hidden.
    return dict(
        wzh=wz[:H], wzx=wz[H:], bz=bz,
        wrh=wr[:H], wrx=wr[H:], br=br,
        whh=wh[:H], whx=wh[H:], bh=bh,
        wo=wo, bo=bo,
    )


def fuse_params(p, compute_dtype=jnp.bfloat16):
    """Fuse gate weights along the output dim (z|r for h-path, z|r|h for x-path),
    cast matmul weights to bf16 (biases stay f32 and are added post-accumulation)."""
    return dict(
        w_hzr=jnp.concatenate([p["wzh"], p["wrh"]], axis=1).astype(compute_dtype),
        w_x3=jnp.concatenate([p["wzx"], p["wrx"], p["whx"]], axis=1).astype(compute_dtype),
        b3=jnp.concatenate([p["bz"], p["br"], p["bh"]], axis=1).astype(jnp.float32),
        whh=p["whh"].astype(compute_dtype),
        wo=p["wo"].astype(compute_dtype),
        bo=p["bo"].astype(jnp.float32),
    )


# ---------------------------------------------------------------------------
# Pure-JAX f32 reference (mirrors the PyTorch forward).
# ---------------------------------------------------------------------------
def ex_gru_reference(x, h, p):
    zt = jax.nn.sigmoid(h @ p["wzh"] + x @ p["wzx"] + p["bz"])
    rt = jax.nn.sigmoid(h @ p["wrh"] + x @ p["wrx"] + p["br"])
    ht_tilda = jnp.tanh((rt * h) @ p["whh"] + x @ p["whx"] + p["bh"])
    new_h = (1.0 - zt) * h + zt * ht_tilda
    out = jax.nn.sigmoid(new_h @ p["wo"] + p["bo"])
    return out, new_h


if __name__ == "__main__":
    # layers_dim = [input_size, hidden_size, ..., output_size]
    INPUT_SIZE, HIDDEN_SIZE, OUTPUT_SIZE = 32, 32, 8
    BATCH, SEQ = 8, 6

    key = jax.random.PRNGKey(0)
    kx, ks, kp = jax.random.split(key, 3)

    x = jax.random.normal(kx, (BATCH, INPUT_SIZE), jnp.float32)
    x_seq = jax.random.normal(ks, (SEQ, BATCH, INPUT_SIZE), jnp.float32)
    hidden0 = jnp.zeros((BATCH, HIDDEN_SIZE), jnp.float32)  # init_hidden

    params = init_params(kp, INPUT_SIZE, HIDDEN_SIZE, OUTPUT_SIZE)
    fused = fuse_params(params, compute_dtype=jnp.bfloat16)

    # --- single-step (the nn.Module forward) ---
    out, new_hidden = ex_gru_forward(x, hidden0, fused)
    out = jax.block_until_ready(out)
    new_hidden = jax.block_until_ready(new_hidden)

    ref_out, ref_h = ex_gru_reference(x, hidden0, params)
    # bf16 weights -> relaxed tolerance vs. f32 reference
    assert jnp.allclose(out, ref_out, atol=2e-2, rtol=2e-2)
    assert jnp.allclose(new_hidden, ref_h, atol=2e-2, rtol=2e-2)

    # --- full sequence in one pallas_call (weights resident, hidden in scratch) ---
    outs, h_fin = ex_gru_sequence(x_seq, hidden0, fused)
    outs = jax.block_until_ready(outs)
    h_fin = jax.block_until_ready(h_fin)

    h_ref = hidden0
    ref_outs = []
    for t in range(SEQ):
        o_t, h_ref = ex_gru_reference(x_seq[t], h_ref, params)
        ref_outs.append(o_t)
    ref_outs = jnp.stack(ref_outs, axis=0)
    assert jnp.allclose(outs, ref_outs, atol=2e-2, rtol=2e-2)
    assert jnp.allclose(h_fin, h_ref, atol=2e-2, rtol=2e-2)

    print("KERNEL_OK")
</pallas_src>

<mosaic_0001>
module attributes {stable_mosaic.version = 11 : i64} {
  func.func @gru_cell_kernel(%arg0: memref<8x32xf32, #tpu.memory_space<vmem>>, %arg1: memref<8x32xf32, #tpu.memory_space<vmem>>, %arg2: memref<32x64xbf16, #tpu.memory_space<vmem>>, %arg3: memref<32x96xbf16, #tpu.memory_space<vmem>>, %arg4: memref<1x96xf32, #tpu.memory_space<vmem>>, %arg5: memref<32x32xbf16, #tpu.memory_space<vmem>>, %arg6: memref<32x8xbf16, #tpu.memory_space<vmem>>, %arg7: memref<1x8xf32, #tpu.memory_space<vmem>>, %arg8: memref<8x8xf32, #tpu.memory_space<vmem>>, %arg9: memref<8x32xf32, #tpu.memory_space<vmem>>) attributes {dimension_semantics = [], scalar_prefetch = 0 : i64, scratch_operands = 0 : i64, tpu.core_type = #tpu.core_type<tc>} {
    %c0 = arith.constant 0 : index
    %c0_0 = arith.constant 0 : index
    %0 = vector.load %arg0[%c0, %c0_0] : memref<8x32xf32, #tpu.memory_space<vmem>>, vector<8x32xf32>
    %c0_1 = arith.constant 0 : index
    %c0_2 = arith.constant 0 : index
    %1 = vector.load %arg1[%c0_1, %c0_2] : memref<8x32xf32, #tpu.memory_space<vmem>>, vector<8x32xf32>
    %c0_3 = arith.constant 0 : index
    %c0_4 = arith.constant 0 : index
    %2 = vector.load %arg2[%c0_3, %c0_4] : memref<32x64xbf16, #tpu.memory_space<vmem>>, vector<32x64xbf16>
    %c0_5 = arith.constant 0 : index
    %c0_6 = arith.constant 0 : index
    %3 = vector.load %arg3[%c0_5, %c0_6] : memref<32x96xbf16, #tpu.memory_space<vmem>>, vector<32x96xbf16>
    %c0_7 = arith.constant 0 : index
    %c0_8 = arith.constant 0 : index
    %4 = vector.load %arg4[%c0_7, %c0_8] : memref<1x96xf32, #tpu.memory_space<vmem>>, vector<1x96xf32>
    %c0_9 = arith.constant 0 : index
    %c0_10 = arith.constant 0 : index
    %5 = vector.load %arg5[%c0_9, %c0_10] : memref<32x32xbf16, #tpu.memory_space<vmem>>, vector<32x32xbf16>
    %c0_11 = arith.constant 0 : index
    %c0_12 = arith.constant 0 : index
    %6 = vector.load %arg6[%c0_11, %c0_12] : memref<32x8xbf16, #tpu.memory_space<vmem>>, vector<32x8xbf16>
    %c0_13 = arith.constant 0 : index
    %c0_14 = arith.constant 0 : index
    %7 = vector.load %arg7[%c0_13, %c0_14] : memref<1x8xf32, #tpu.memory_space<vmem>>, vector<1x8xf32>
    %8 = arith.truncf %0 : vector<8x32xf32> to vector<8x32xbf16>
    %cst = arith.constant dense<0.000000e+00> : vector<8x64xf32>
    %9 = tpu.matmul %8, %2, %cst {dimension_numbers = #tpu.dot_dimension_numbers<[1], [0], [0], [1], [0, 0, 1, 1], [], []>} : vector<8x32xbf16>, vector<32x64xbf16>, vector<8x64xf32> -> vector<8x64xf32>
    %10 = arith.truncf %1 : vector<8x32xf32> to vector<8x32xbf16>
    %cst_15 = arith.constant dense<0.000000e+00> : vector<8x96xf32>
    %11 = tpu.matmul %10, %3, %cst_15 {dimension_numbers = #tpu.dot_dimension_numbers<[1], [0], [0], [1], [0, 0, 1, 1], [], []>} : vector<8x32xbf16>, vector<32x96xbf16>, vector<8x96xf32> -> vector<8x96xf32>
    %12 = vector.broadcast %4 : vector<1x96xf32> to vector<8x96xf32>
    %13 = arith.addf %11, %12 : vector<8x96xf32>
    %14 = vector.extract_strided_slice %9 {offsets = [0, 0], sizes = [8, 32], strides = [1, 1]} : vector<8x64xf32> to vector<8x32xf32>
    %15 = vector.extract_strided_slice %13 {offsets = [0, 0], sizes = [8, 32], strides = [1, 1]} : vector<8x96xf32> to vector<8x32xf32>
    %16 = arith.addf %14, %15 : vector<8x32xf32>
    %17 = arith.negf %16 : vector<8x32xf32>
    %18 = math.exp %17 : vector<8x32xf32>
    %cst_16 = arith.constant 1.000000e+00 : f32
    %19 = vector.broadcast %cst_16 : f32 to vector<8x32xf32>
    %20 = arith.addf %19, %18 : vector<8x32xf32>
    %21 = arith.divf %19, %20 : vector<8x32xf32>
    %22 = vector.extract_strided_slice %9 {offsets = [0, 32], sizes = [8, 32], strides = [1, 1]} : vector<8x64xf32> to vector<8x32xf32>
    %23 = vector.extract_strided_slice %13 {offsets = [0, 32], sizes = [8, 32], strides = [1, 1]} : vector<8x96xf32> to vector<8x32xf32>
    %24 = arith.addf %22, %23 : vector<8x32xf32>
    %25 = arith.negf %24 : vector<8x32xf32>
    %26 = math.exp %25 : vector<8x32xf32>
    %cst_17 = arith.constant 1.000000e+00 : f32
    %27 = vector.broadcast %cst_17 : f32 to vector<8x32xf32>
    %28 = arith.addf %27, %26 : vector<8x32xf32>
    %29 = arith.divf %27, %28 : vector<8x32xf32>
    %30 = arith.mulf %29, %0 : vector<8x32xf32>
    %31 = arith.truncf %30 : vector<8x32xf32> to vector<8x32xbf16>
    %cst_18 = arith.constant dense<0.000000e+00> : vector<8x32xf32>
    %32 = tpu.matmul %31, %5, %cst_18 {dimension_numbers = #tpu.dot_dimension_numbers<[1], [0], [0], [1], [0, 0, 1, 1], [], []>} : vector<8x32xbf16>, vector<32x32xbf16>, vector<8x32xf32> -> vector<8x32xf32>
    %33 = vector.extract_strided_slice %13 {offsets = [0, 64], sizes = [8, 32], strides = [1, 1]} : vector<8x96xf32> to vector<8x32xf32>
    %34 = arith.addf %32, %33 : vector<8x32xf32>
    %35 = math.tanh %34 : vector<8x32xf32>
    %36 = arith.subf %35, %0 : vector<8x32xf32>
    %37 = arith.mulf %21, %36 : vector<8x32xf32>
    %38 = arith.addf %0, %37 : vector<8x32xf32>
    %39 = arith.truncf %38 : vector<8x32xf32> to vector<8x32xbf16>
    %cst_19 = arith.constant dense<0.000000e+00> : vector<8x8xf32>
    %40 = tpu.matmul %39, %6, %cst_19 {dimension_numbers = #tpu.dot_dimension_numbers<[1], [0], [0], [1], [0, 0, 1, 1], [], []>} : vector<8x32xbf16>, vector<32x8xbf16>, vector<8x8xf32> -> vector<8x8xf32>
    %41 = vector.broadcast %7 : vector<1x8xf32> to vector<8x8xf32>
    %42 = arith.addf %40, %41 : vector<8x8xf32>
    %43 = arith.negf %42 : vector<8x8xf32>
    %44 = math.exp %43 : vector<8x8xf32>
    %cst_20 = arith.constant 1.000000e+00 : f32
    %45 = vector.broadcast %cst_20 : f32 to vector<8x8xf32>
    %46 = arith.addf %45, %44 : vector<8x8xf32>
    %47 = arith.divf %45, %46 : vector<8x8xf32>
    %c0_21 = arith.constant 0 : index
    %c0_22 = arith.constant 0 : index
    %48 = vector.load %arg8[%c0_21, %c0_22] : memref<8x8xf32, #tpu.memory_space<vmem>>, vector<8x8xf32>
    tpu.vector_store %arg8[%c0_21, %c0_22], %47 {strides = array<i32>} : memref<8x8xf32, #tpu.memory_space<vmem>>, vector<8x8xf32>,
    %c0_23 = arith.constant 0 : index
    %c0_24 = arith.constant 0 : index
    %49 = vector.load %arg9[%c0_23, %c0_24] : memref<8x32xf32, #tpu.memory_space<vmem>>, vector<8x32xf32>
    tpu.vector_store %arg9[%c0_23, %c0_24], %38 {strides = array<i32>} : memref<8x32xf32, #tpu.memory_space<vmem>>, vector<8x32xf32>,
    return
  }
}

</mosaic_0001>

<bundles_post_ra>
// kernel: tpu_custom_call.1
= control target key start
LH: loop header
LB: loop body
LE: loop exit
PB: predicated region body
PF: predicated region fallthrough
CT: control target
= control target key end

     0   :  { %15 = vsyncpa [#allocation3], 0  ;;  %s737_s0 = inlined_call_operand.hbm [shape: f32[8,32], index: 0, kind: input, shape index: {}]   ;;  %s738_s1 = inlined_call_operand.hbm [shape: f32[8,32], index: 1, kind: input, shape index: {}]   ;;  %s739_s2 = inlined_call_operand.vmem [shape: bf16[32,64], index: 2, kind: input, shape index: {}]   ;;  %s740_s3 = inlined_call_operand.hbm [shape: bf16[32,96], index: 3, kind: input, shape index: {}]   ;;  %s741_s4 = inlined_call_operand.vmem [shape: f32[1,96], index: 4, kind: input, shape index: {}]   ;;  %s742_s5 = inlined_call_operand.hbm [shape: bf16[32,32], index: 5, kind: input, shape index: {}]   ;;  %s743_s6 = inlined_call_operand.vmem [shape: bf16[32,8], index: 6, kind: input, shape index: {}]   ;;  %s744_s7 = inlined_call_operand.vmem [shape: f32[1,8], index: 7, kind: input, shape index: {}]   ;;  %s745_s8 = inlined_call_operand.hbm [shape: f32[8,8], index: 8, kind: output, shape index: {0}]   ;;  %s746_s9 = inlined_call_operand.hbm [shape: f32[8,32], index: 9, kind: output, shape index: {1}]  }
   0x1   :  { %16 = vsyncpa [#allocation6], 0 }
   0x2   :  { %17 = vsyncpa [#allocation9], 0 }
   0x3   :  { %18 = vsyncpa [#allocation4], 0 }
   0x4   :  { %19 = vsyncpa [#allocation12], 0  ;;  %s625_s30 = smov [#allocation5]   ;;  %s626_s11 = smov [#allocation2]  }
   0x5   :  { %s36_s10 = sshll.u32 %s625_s30, 4  ;;  %s26_s12 = sshll.u32 %s626_s11, 4  ;;  %s37_s10 = int_to_ptr.vmem [resolvable:$true] %s36_s10  ;;  %s27_s12 = int_to_ptr.vmem [resolvable:$true] %s26_s12 }
   0x6   :  { %s503_s13 = scalar_lea.vmem %s37_s10, 128  ;;  %p508_p1 = scmp.lt.s32.totalorder %s37_s10, %s37_s10 }
   0x7   :  { %p504_p0 = scmp.ne.s32.totalorder %s37_s10, %s503_s13  ;;  %p509_p2 = scmp.lt.s32.totalorder %s503_s13, %s503_s13 }
   0x9   :  { %p510_p3 = por %p509_p2, %p508_p1 }
   0xb   :  { %p511_p4 = pnand %p510_p3, %p504_p0 }
   0xd   :  { %514 = shalt.err (!%p511_p4)
}
   0xe   :  { %39 = dma.hbm_to_vmem [thread:$0]  %s738_s1, 128, %s37_s10, [#allocation6]  }
   0xf   :  { %s523_s16 = scalar_lea.vmem %s27_s12, 128  ;;  %p528_p6 = scmp.lt.s32.totalorder %s27_s12, %s27_s12 }
  0x10   :  { %p524_p5 = scmp.ne.s32.totalorder %s27_s12, %s523_s16  ;;  %p529_p7 = scmp.lt.s32.totalorder %s523_s16, %s523_s16 }
  0x12   :  { %p530_p8 = por %p529_p7, %p528_p6 }
  0x14   :  { %p531_p9 = pnand %p530_p8, %p524_p5 }
  0x16   :  { %534 = shalt.err (!%p531_p9)
}
  0x17   :  { %29 = dma.hbm_to_vmem [thread:$0]  %s737_s0, 128, %s27_s12, [#allocation3]  }
  0x18   :  { %s627_s19 = smov [#allocation7]  }
  0x19   :  { %s47_s20 = sshll.u32 %s627_s19, 4  ;;  %s48_s20 = int_to_ptr.vmem [resolvable:$true] %s47_s20 }
  0x1a   :  { %s543_s21 = scalar_lea.vmem %s48_s20, 256  ;;  %p548_p11 = scmp.lt.s32.totalorder %s48_s20, %s48_s20 }
  0x1b   :  { %p544_p10 = scmp.ne.s32.totalorder %s48_s20, %s543_s21  ;;  %p549_p12 = scmp.lt.s32.totalorder %s543_s21, %s543_s21 }
  0x1d   :  { %p550_p13 = por %p549_p12, %p548_p11 }
  0x1f   :  { %p551_p0 = pnand %p550_p13, %p544_p10 }
  0x21   :  { %554 = shalt.err (!%p551_p0)
}
  0x22   :  { %s628_s1 = smov 64   ;;  %s629_s22 = smov 4  }
  0x23   :  { %53 = dma.hbm_to_vmem [thread:$0]  %s740_s3, 256, %s48_s20, [#allocation6], %s628_s1, %s628_s1, %s629_s22  }
  0x24   :  { %s630_s25 = smov [#allocation8]  }
  0x25   :  { %s61_s0 = sshll.u32 %s630_s25, 4  ;;  %s62_s0 = int_to_ptr.vmem [resolvable:$true] %s61_s0 }
  0x26   :  { %s563_s26 = scalar_lea.vmem %s62_s0, 256  ;;  %p568_p2 = scmp.lt.s32.totalorder %s62_s0, %s62_s0 }
  0x27   :  { %p564_p1 = scmp.ne.s32.totalorder %s62_s0, %s563_s26  ;;  %p569_p3 = scmp.lt.s32.totalorder %s563_s26, %s563_s26 }
  0x29   :  { %p570_p4 = por %p569_p3, %p568_p2 }
  0x2b   :  { %p571_p5 = pnand %p570_p4, %p564_p1 }
  0x2d   :  { %574 = shalt.err (!%p571_p5)
}
  0x2e   :  { %67 = dma.hbm_to_vmem [thread:$0]  %s742_s5, 256, %s62_s0, [#allocation9], %s628_s1, %s628_s1, %s629_s22  }
  0x2f   :  { %615 = dma.done.wait [#allocation3], 128  }
  0x30   :  { %616 = vsyncadd [#allocation3], 4294967168 }
  0x31   :  { %617 = dma.done.wait [#allocation6], 384  }
  0x32   :  { %618 = vsyncadd [#allocation6], 4294966912 }
  0x33   :  { %619 = dma.done.wait [#allocation9], 256  }
  0x34   :  { %620 = vsyncadd [#allocation9], 4294967040  ;;  %v631_v0 = vmov 0.0   ;;  %vm632_vm0 = vmmov 0   ;;  %v477_v1 = vld [vmem:[%s739_s2 + $0x8] sm:$0xff]   ;;  %v478_v2 = vld [vmem:[#allocation7 + $0x8] sm:$0xff]  }
  0x35   :  { %433 = vmatprep.subr.bf16.mxu0 %v631_v0  ;;  %441 = vmatprep.subr.bf16.mxu1 %v631_v0  ;;  %v479_v3 = vld [vmem:[%s739_s2] sm:$0xff]   ;;  %v480_v4 = vld [vmem:[#allocation7] sm:$0xff]   ;;  %vm118_vm1 = vcmask 261120   ;;  %v86_v6 = vld [vmem:[#allocation5] sm:$0xff]  ;;  %s633_s10 = smov 32   ;;  %s635_s16 = smov [#allocation11]  }
  0x36   :  { %437 = vmatprep.mubr.msk.bf16.mxu0 %vm632_vm0, %v631_v0  ;;  %445 = vmatprep.mubr.msk.bf16.mxu1 %vm632_vm0, %v631_v0  ;;  %v85_v5 = vld [vmem:[#allocation2] sm:$0xff]  ;;  %v162_v8 = vpack.c.bf16 %v86_v6, %v86_v6  ;;  %v481_v9 = vld [vmem:[#allocation8 + $0x8] sm:$0xff]  }
  0x37   :  { %434 = vmatpush3.bf16.msra.mxu0 %v477_v1  ;;  %442 = vmatpush3.bf16.msra.mxu1 %v478_v2  ;;  %v105_v7 = vpack.c.bf16 %v85_v5, %v85_v5  ;;  %v482_v10 = vld [vmem:[#allocation8] sm:$0xff]   ;;  %v483_v30 = vld [vmem:[%s743_s6 + $0x8] sm:$0xff]  }
  0x38   :  { %435 = vmatprep.subr.bf16.mxu0 %v631_v0  ;;  %443 = vmatprep.subr.bf16.mxu1 %v631_v0  ;;  %v408_v11 = vld [vmem:[%s741_s4] ss:$0 sm:$0xff]  ;;  %s634_s4 = smov 96  }
  0x39   :  { %232 = vrot.lane.b32.xlu0 %v85_v5, %s633_s10  ;;  %v484_v31 = vld [vmem:[%s743_s6] sm:$0xff]   ;;  %s390_s6 = sshll.u32 %s635_s16, 4  ;;  %s391_s6 = int_to_ptr.vmem [resolvable:$true] %s390_s6 }
  0x3a   :  { %s575_s17 = scalar_lea.vmem %s391_s6, 128  ;;  %p580_p7 = scmp.lt.s32.totalorder %s391_s6, %s391_s6 }
  0x3b   :  { %436 = vmatpush3.bf16.msra.mxu0 %v479_v3  ;;  %444 = vmatpush3.bf16.msra.mxu1 %v480_v4  ;;  %p576_p6 = scmp.ne.s32.totalorder %s391_s6, %s575_s17  ;;  %p581_p8 = scmp.lt.s32.totalorder %s575_s17, %s575_s17 }
  0x3c   :  { %449 = vmatprep.subr.bf16.mxu0 %v631_v0  ;;  %457 = vmatprep.subr.bf16.mxu1 %v631_v0 }
  0x3d   :  { %p582_p9 = por %p581_p8, %p580_p7 }
  0x3e   :  { %438 = vmatmul.mubr.msk.bf16.vlgmr.msra.gmra.mxu0 %vm118_vm1, %v105_v7  ;;  %446 = vmatmul.mubr.msk.bf16.vlgmr.msra.gmra.mxu1 %vm118_vm1, %v162_v8 }
  0x3f   :  { %453 = vmatprep.mubr.msk.bf16.mxu0 %vm632_vm0, %v631_v0  ;;  %461 = vmatprep.mubr.msk.bf16.mxu1 %vm632_vm0, %v631_v0  ;;  %p583_p10 = pnand %p582_p9, %p576_p6 }
  0x40   :  { %450 = vmatpush3.bf16.msra.mxu0 %v481_v9  ;;  %458 = vmatpush3.bf16.msra.mxu1 %v483_v30 }
  0x41   :  { %451 = vmatprep.subr.bf16.mxu0 %v631_v0  ;;  %459 = vmatprep.subr.bf16.mxu1 %v631_v0 }
  0x44   :  { %452 = vmatpush3.bf16.msra.mxu0 %v482_v10  ;;  %460 = vmatpush3.bf16.msra.mxu1 %v484_v31 }
  0xab   :  { %v233_v25 = vpop.permute.xlu0 %232 }
  0xfe   :  { %v156_v12 = vpop.f32.mrf.mxu0  ;;  %v218_v13 = vpop.f32.mrf.mxu1 }
  0xff   :  { %v219_v14 = vadd.f32 %v408_v11, %v218_v13 }
 0x100   :  { %v439_v15 = vpop.f32.mrf.mxu0  ;;  %v447_v16 = vpop.f32.mrf.mxu1 }
 0x101   :  { %v224_v17 = vadd.f32 %v219_v14, %v156_v12  ;;  %253 = vrot.lane.b32.xlu1 %v219_v14, %s628_s1 }
 0x102   :  { %v159_v18 = vpop.f32.mrf.mxu0  ;;  %v221_v19 = vpop.f32.mrf.mxu1 }
 0x103   :  { %v412_v20 = vmul.f32 -1.442695, %v224_v17 }
 0x104   :  { %v440_v21 = vpop.f32.mrf.mxu0  ;;  %v448_v22 = vpop.f32.mrf.mxu1 }
 0x105   :  { %485 = vpow2.f32 %v412_v20 }
 0x112   :  { %v486_v23 = vpop.eup %485 }
 0x113   :  { %v228_v24 = vadd.f32 1.0, %v486_v23 }
 0x115   :  { %487 = vrcp.f32 %v228_v24 }
 0x122   :  { %v488_v26 = vpop.eup %487 }
 0x123   :  { %v235_v27 = vmul.f32 %v488_v26, %v233_v25 }
 0x125   :  { %v236_v28 = vpack.c.bf16 %v235_v27, %v235_v27 }
 0x127   :  { %238 = vrot.lane.b32.xlu0 %v236_v28, %s634_s4 }
 0x173   :  { %v254_v32 = vpop.permute.xlu1 %253 }
 0x199   :  { %v239_v29 = vpop.permute.xlu0 %238 }
 0x19a   :  { %454 = vmatmul.mubr.msk.bf16.vlgmr.msra.gmra.mxu0 %vm118_vm1, %v239_v29 }
 0x25a   :  { %v293_v33 = vpop.f32.mrf.mxu0 }
 0x25b   :  { %v294_v34 = vadd.f32 %v293_v33, %v254_v32 }
 0x25c   :  { %v455_v35 = vpop.f32.mrf.mxu0 }
 0x25d   :  { %489 = vtanh.f32 %v294_v34 }
 0x25e   :  { %v296_v36 = vpop.f32.mrf.mxu0 }
 0x260   :  { %v456_v37 = vpop.f32.mrf.mxu0 }
 0x26a   :  { %v490_v38 = vpop.eup %489 }
 0x26b   :  { %v300_v39 = vsub.f32 %v490_v38, %v85_v5 }
 0x26d   :  { %v301_v40 = vmul.f32 %v488_v26, %v300_v39 }
 0x26f   :  { %v302_v41 = vadd.f32 %v301_v40, %v85_v5 }
 0x271   :  { %v303_v42 = vpack.c.bf16 %v302_v41, %v302_v41  ;;  %373 = vst.msk [vmem:[#allocation11] sm:$0xff] %vm118_vm1, %v302_v41 }
 0x273   :  { %462 = vmatmul.mubr.msk.bf16.vlgmr.msra.gmra.mxu1 %vm118_vm1, %v303_v42 }
 0x274   :  { %586 = shalt.err (!%p583_p10)
}
 0x275   :  { %393 = dma.vmem_to_hbm [thread:$0]  %s391_s6, 128, %s746_s9, [#allocation12]   ;;  %v416_v43 = vld [vmem:[%s744_s7] ss:$0 sm:$0xff]  ;;  %vm371_vm2 = vcmask 64512  }
 0x276   :  { %s636_s1 = smov [#allocation10]  }
 0x277   :  { %s380_s22 = sshll.u32 %s636_s1, 4  ;;  %s381_s22 = int_to_ptr.vmem [resolvable:$true] %s380_s22 }
 0x278   :  { %s595_s9 = scalar_lea.vmem %s381_s22, 128  ;;  %p600_p12 = scmp.lt.s32.totalorder %s381_s22, %s381_s22 }
 0x279   :  { %p596_p11 = scmp.ne.s32.totalorder %s381_s22, %s595_s9  ;;  %p601_p13 = scmp.lt.s32.totalorder %s595_s9, %s595_s9 }
 0x27b   :  { %p602_p0 = por %p601_p13, %p600_p12 }
 0x27d   :  { %p603_p1 = pnand %p602_p0, %p596_p11 }
 0x333   :  { %v359_v44 = vpop.f32.mrf.mxu1 }
 0x334   :  { %v360_v45 = vadd.f32 %v416_v43, %v359_v44 }
 0x335   :  { %v463_v46 = vpop.f32.mrf.mxu1 }
 0x336   :  { %v420_v47 = vmul.f32 -1.442695, %v360_v45 }
 0x337   :  { %v362_v48 = vpop.f32.mrf.mxu1 }
 0x338   :  { %491 = vpow2.f32 %v420_v47 }
 0x339   :  { %v464_v49 = vpop.f32.mrf.mxu1 }
 0x345   :  { %v492_v50 = vpop.eup %491 }
 0x346   :  { %v368_v51 = vadd.f32 1.0, %v492_v50 }
 0x348   :  { %493 = vrcp.f32 %v368_v51 }
 0x355   :  { %v494_v52 = vpop.eup %493 }
 0x356   :  { %372 = vst.msk [vmem:[#allocation10] sm:$0xff] %vm371_vm2, %v494_v52 }
 0x357   :  { %606 = shalt.err (!%p603_p1)
}
 0x358   :  { %383 = dma.vmem_to_hbm [thread:$0]  %s381_s22, 128, %s745_s8, [#allocation4]  }
 0x359   :  { %621 = dma.done.wait [#allocation4], 128  }
 0x35a   :  { %622 = vsyncadd [#allocation4], 4294967168 }
 0x35b   :  { %623 = dma.done.wait [#allocation12], 128  }
 0x35c   :  { %624 = vsyncadd [#allocation12], 4294967168 }
 0x35d   :  { %400 = vsyncpa [#allocation3], 1 }
 0x35e   :  { %401 = vsyncpa [#allocation6], 1 }
 0x35f   :  { %402 = vsyncpa [#allocation9], 1 }
 0x360   :  { %403 = vsyncpa [#allocation4], 1 }
 0x361   :  { %404 = vsyncpa [#allocation12], 1 }

</bundles_post_ra>
